<compile_context>
chip_gen: v7x
topology: tpu7x:2x2x1
jax: 0.10.0
libtpu: 0.0.40
codegen_flags: <defaults>
</compile_context>

<pallas_src>
import functools

import jax
import jax.numpy as jnp
from jax import lax
from jax.experimental import pallas as pl
from jax.experimental.pallas import tpu as pltpu

EPS = 1e-12  # F.normalize default eps


def _round_up(x, m):
    return (x + m - 1) // m * m


def _choose_fold(batch, d_emb):
    """Fold factor so fold * d_emb == 128 (lane-dense output), if layout-legal."""
    if d_emb < 128 and 128 % d_emb == 0:
        fold = 128 // d_emb
        if batch % fold == 0:
            return fold
    return 1


def _choose_block_rows(view_rows, bytes_per_row, granularity=256,
                       target_bytes=2 << 20, vmem_budget_bytes=24 << 20):
    """Streamed (folded) rows per grid step.

    Targets ~1-2 MiB of HBM traffic per step, keeps the double-buffered blocks
    inside an explicit VMEM budget (v7x: 64 MiB physical), rounds to a multiple
    of 256 rows (MXU row granularity / bf16 sublanes), and for very large
    batches keeps >= ~8 grid steps so the batch-parallel axis can feed both
    v7x TensorCores.
    """
    vmem_cap = max(granularity, vmem_budget_bytes // (2 * bytes_per_row))
    # Whole batch fits comfortably in one block (block == array dims is always
    # layout-legal, even for tiny / odd row counts).
    if view_rows * bytes_per_row <= target_bytes and view_rows <= vmem_cap:
        return view_rows
    t = max(granularity, target_bytes // bytes_per_row)
    t = min(t, vmem_cap)
    if view_rows >= 8 * granularity:
        min_stream_rows = max(granularity, (1 << 20) // bytes_per_row)  # ~1 MiB floor
        t = min(t, max(min_stream_rows, pl.cdiv(view_rows, 8)))
    return max(granularity, (t // granularity) * granularity)


def _listing_embedding_kernel(x_ref, w1_ref, b1_ref, w2_ref, b2_ref, jmat_ref, o_ref):
    # x_ref : [TB, fold*D_in]          w1_ref: [fold*D_in, fold*H]   (blockdiag)
    # b1_ref: [1, fold*H]  (f32)       w2_ref: [fold*H, fold*D_emb]  (blockdiag)
    # b2_ref: [1, fold*D_emb] (f32)    jmat  : [fold*D_emb, fold*D_emb] segment-sum
    # o_ref : [TB, fold*D_emb]
    #
    # Matmuls run on the MXU in the operands' native dtype with f32
    # accumulation; all elementwise math stays f32 (v5e-safe).
    h = jnp.dot(x_ref[...], w1_ref[...], preferred_element_type=jnp.float32)
    h = jnp.maximum(h + b1_ref[...], 0.0)
    # Only down-cast when the second-layer weights are genuinely low precision.
    if w2_ref.dtype != jnp.float32:
        h = h.astype(w2_ref.dtype)
    y = jnp.dot(h, w2_ref[...], preferred_element_type=jnp.float32)
    y = y + b2_ref[...]

    # Per-logical-row sum of squares: jmat is block-diagonal ones, so each
    # D_emb-wide lane segment is reduced and broadcast back in one (idle-MXU)
    # matmul -- keeps the whole epilogue lane-dense, no cross-lane VPU work.
    sumsq = jnp.dot(y * y, jmat_ref[...], preferred_element_type=jnp.float32)
    # y / max(||y||, eps) == y * rsqrt(max(sum(y^2), eps^2))  (sqrt monotone)
    inv = lax.rsqrt(jnp.maximum(sumsq, EPS * EPS))
    o_ref[...] = (y * inv).astype(o_ref.dtype)


@functools.partial(jax.jit, static_argnames=("out_dtype", "block_rows"))
def listing_embedding_forward(x, w1, b1, w2, b2, out_dtype=None, block_rows=None):
    """x: [B, D_in]; w1: [D_in, H]; b1: [H]; w2: [H, D_emb]; b2: [D_emb].

    Weights are stored already transposed ([D_in, H] / [H, D_emb]) so the
    kernel does plain row-major MXU matmuls.  Output: [B, D_emb],
    L2-normalized along the last axis.  `out_dtype` defaults to x.dtype (pass
    jnp.bfloat16 to halve writeback bytes if the consumer allows it).
    """
    B, d_in = x.shape
    H = w1.shape[1]
    d_emb = w2.shape[1]
    out_dtype = jnp.dtype(out_dtype or x.dtype)

    # ---- layout decisions (all static) -------------------------------------
    fold = _choose_fold(B, d_emb)            # fold*d_emb == 128 when possible
    view_rows = B // fold                    # rows of the streamed (folded) view

    in_row_bytes = fold * d_in * x.dtype.itemsize
    out_row_bytes = fold * d_emb * out_dtype.itemsize
    if block_rows is None:
        block_rows = _choose_block_rows(view_rows, in_row_bytes + out_row_bytes)
    grid = (pl.cdiv(view_rows, block_rows),)

    # ---- fold params into the lane-dense layout (tiny, VMEM-resident) ------
    x_view = x.reshape(view_rows, fold * d_in)                 # free reshape
    eye1 = jnp.eye(fold, dtype=w1.dtype)
    w1f = jnp.kron(eye1, w1)                                   # [fold*D_in, fold*H]
    w2f = jnp.kron(eye1.astype(w2.dtype), w2)                  # [fold*H, fold*D_emb]
    b1f = jnp.tile(b1.astype(jnp.float32).reshape(1, H), (1, fold))
    b2f = jnp.tile(b2.astype(jnp.float32).reshape(1, d_emb), (1, fold))
    jmat = jnp.kron(jnp.eye(fold, dtype=jnp.float32),
                    jnp.ones((d_emb, d_emb), jnp.float32))     # segment sum+bcast

    # ---- VMEM / cost accounting ---------------------------------------------
    param_bytes = int(sum(a.size * a.dtype.itemsize
                          for a in (w1f, b1f, w2f, b2f, jmat)))
    block_io_bytes = block_rows * (in_row_bytes + out_row_bytes)
    interm_bytes = block_rows * fold * (H + 2 * d_emb) * 4      # h, y, y^2 in f32
    vmem_est = 2 * block_io_bytes + param_bytes + interm_bytes
    vmem_limit = int(min(64 << 20, max(32 << 20, 2 * vmem_est)))

    flops = int(2 * B * fold * (d_in * H + H * d_emb + d_emb * d_emb))
    bytes_accessed = int(x.size * x.dtype.itemsize + param_bytes
                         + B * d_emb * out_dtype.itemsize)

    out_view = pl.pallas_call(
        _listing_embedding_kernel,
        out_shape=jax.ShapeDtypeStruct((view_rows, fold * d_emb), out_dtype),
        grid_spec=pl.GridSpec(
            grid=grid,
            in_specs=[
                # Streaming batch tile of activations (folded view).
                pl.BlockSpec((block_rows, fold * d_in), lambda i: (i, 0)),
                # Weights / biases / segment-sum matrix: same block every step
                # -> VMEM-resident across the whole grid.
                pl.BlockSpec((fold * d_in, fold * H), lambda i: (0, 0)),
                pl.BlockSpec((1, fold * H), lambda i: (0, 0)),
                pl.BlockSpec((fold * H, fold * d_emb), lambda i: (0, 0)),
                pl.BlockSpec((1, fold * d_emb), lambda i: (0, 0)),
                pl.BlockSpec((fold * d_emb, fold * d_emb), lambda i: (0, 0)),
            ],
            out_specs=pl.BlockSpec((block_rows, fold * d_emb), lambda i: (i, 0)),
        ),
        compiler_params=pltpu.CompilerParams(
            dimension_semantics=("parallel",),
            vmem_limit_bytes=vmem_limit),
        cost_estimate=pl.CostEstimate(
            flops=flops,
            transcendentals=int(B * d_emb),
            bytes_accessed=bytes_accessed),
    )(x_view, w1f, b1f, w2f, b2f, jmat)

    return out_view.reshape(B, d_emb)        # free row-major reshape, no slice


def _init_params(key, input_dim, hidden_dim, embedding_dim):
    """Deterministic PyTorch-style uniform(-1/sqrt(fan_in), 1/sqrt(fan_in)) init."""
    k1, k2, k3, k4 = jax.random.split(key, 4)
    bound1 = 1.0 / jnp.sqrt(input_dim)
    bound2 = 1.0 / jnp.sqrt(hidden_dim)
    w1 = jax.random.uniform(k1, (input_dim, hidden_dim), jnp.float32, -bound1, bound1)
    b1 = jax.random.uniform(k2, (hidden_dim,), jnp.float32, -bound1, bound1)
    w2 = jax.random.uniform(k3, (hidden_dim, embedding_dim), jnp.float32, -bound2, bound2)
    b2 = jax.random.uniform(k4, (embedding_dim,), jnp.float32, -bound2, bound2)
    return w1, b1, w2, b2


def _reference(x, w1, b1, w2, b2):
    h = jnp.maximum(x @ w1 + b1, 0.0)
    y = h @ w2 + b2
    n = jnp.sqrt(jnp.sum(y * y, axis=1, keepdims=True))
    return y / jnp.maximum(n, EPS)


if __name__ == "__main__":
    input_dim, hidden_dim, embedding_dim = 16, 64, 32
    key = jax.random.PRNGKey(0)
    kx, kp = jax.random.split(key)
    w1, b1, w2, b2 = _init_params(kp, input_dim, hidden_dim, embedding_dim)

    # 1) Small batch, folded lane-dense path (8 % 4 == 0 -> fold=4, 128 lanes).
    x = jax.random.normal(kx, (8, input_dim), jnp.float32)
    out = jax.block_until_ready(listing_embedding_forward(x, w1, b1, w2, b2))
    ref = _reference(x, w1, b1, w2, b2)
    assert out.shape == (8, embedding_dim)
    assert jnp.allclose(out, ref, atol=1e-5, rtol=1e-5), "mismatch (folded path)"

    # 2) Ragged batch (37 % 4 != 0) -> unfolded fallback; no pad / slice round trip.
    x2 = jax.random.normal(jax.random.PRNGKey(1), (37, input_dim), jnp.float32)
    out2 = jax.block_until_ready(listing_embedding_forward(x2, w1, b1, w2, b2))
    ref2 = _reference(x2, w1, b1, w2, b2)
    assert out2.shape == (37, embedding_dim)
    assert jnp.allclose(out2, ref2, atol=1e-5, rtol=1e-5), "mismatch (ragged batch)"

    # 3) Multi-step grid with a masked partial last block (explicit small tile).
    x3 = jax.random.normal(jax.random.PRNGKey(2), (1000, input_dim), jnp.float32)
    out3 = jax.block_until_ready(
        listing_embedding_forward(x3, w1, b1, w2, b2, block_rows=64))
    ref3 = _reference(x3, w1, b1, w2, b2)
    assert out3.shape == (1000, embedding_dim)
    assert jnp.allclose(out3, ref3, atol=1e-5, rtol=1e-5), "mismatch (multi-block)"

    # 4) bf16 streaming (x / weights / out bf16, f32 accumulation + elementwise).
    outb = jax.block_until_ready(
        listing_embedding_forward(x3.astype(jnp.bfloat16),
                                  w1.astype(jnp.bfloat16), b1,
                                  w2.astype(jnp.bfloat16), b2,
                                  out_dtype=jnp.bfloat16))
    assert outb.dtype == jnp.bfloat16
    assert float(jnp.max(jnp.abs(outb.astype(jnp.float32) - ref3))) < 5e-2, \
        "mismatch (bf16 streaming)"

    print("KERNEL_OK")
</pallas_src>

<mosaic_0001>
module attributes {stable_mosaic.version = 11 : i64} {
  func.func @_listing_embedding_kernel(%arg0: i32, %arg1: memref<2x64xf32, #tpu.memory_space<vmem>>, %arg2: memref<64x256xf32, #tpu.memory_space<vmem>>, %arg3: memref<1x256xf32, #tpu.memory_space<vmem>>, %arg4: memref<256x128xf32, #tpu.memory_space<vmem>>, %arg5: memref<1x128xf32, #tpu.memory_space<vmem>>, %arg6: memref<128x128xf32, #tpu.memory_space<vmem>>, %arg7: memref<2x128xf32, #tpu.memory_space<vmem>>) attributes {dimension_semantics = [#tpu.dimension_semantics<parallel>], iteration_bounds = array<i64: 1>, scalar_prefetch = 0 : i64, scratch_operands = 0 : i64, tpu.core_type = #tpu.core_type<tc>, window_params = [{transform_indices = @transform_0, window_bounds = array<i64: 2, 64>}, {pipeline_mode = #tpu.pipeline_mode<synchronous>, transform_indices = @transform_1, window_bounds = array<i64: 64, 256>}, {pipeline_mode = #tpu.pipeline_mode<synchronous>, transform_indices = @transform_2, window_bounds = array<i64: 1, 256>}, {pipeline_mode = #tpu.pipeline_mode<synchronous>, transform_indices = @transform_3, window_bounds = array<i64: 256, 128>}, {pipeline_mode = #tpu.pipeline_mode<synchronous>, transform_indices = @transform_4, window_bounds = array<i64: 1, 128>}, {pipeline_mode = #tpu.pipeline_mode<synchronous>, transform_indices = @transform_5, window_bounds = array<i64: 128, 128>}, {transform_indices = @transform_6, window_bounds = array<i64: 2, 128>}]} {
    %c0 = arith.constant 0 : index
    %c0_0 = arith.constant 0 : index
    %0 = vector.load %arg1[%c0, %c0_0] : memref<2x64xf32, #tpu.memory_space<vmem>>, vector<2x64xf32>
    %c0_1 = arith.constant 0 : index
    %c0_2 = arith.constant 0 : index
    %1 = vector.load %arg2[%c0_1, %c0_2] : memref<64x256xf32, #tpu.memory_space<vmem>>, vector<64x256xf32>
    %cst = arith.constant dense<0.000000e+00> : vector<2x256xf32>
    %2 = tpu.matmul %0, %1, %cst {dimension_numbers = #tpu.dot_dimension_numbers<[1], [0], [0], [1], [0, 0, 1, 1], [], []>} : vector<2x64xf32>, vector<64x256xf32>, vector<2x256xf32> -> vector<2x256xf32>
    %c0_3 = arith.constant 0 : index
    %c0_4 = arith.constant 0 : index
    %3 = vector.load %arg3[%c0_3, %c0_4] : memref<1x256xf32, #tpu.memory_space<vmem>>, vector<1x256xf32>
    %4 = vector.broadcast %3 : vector<1x256xf32> to vector<2x256xf32>
    %5 = arith.addf %2, %4 : vector<2x256xf32>
    %cst_5 = arith.constant 0.000000e+00 : f32
    %6 = vector.broadcast %cst_5 : f32 to vector<2x256xf32>
    %7 = arith.maximumf %5, %6 : vector<2x256xf32>
    %c0_6 = arith.constant 0 : index
    %c0_7 = arith.constant 0 : index
    %8 = vector.load %arg4[%c0_6, %c0_7] : memref<256x128xf32, #tpu.memory_space<vmem>>, vector<256x128xf32>
    %cst_8 = arith.constant dense<0.000000e+00> : vector<2x128xf32>
    %9 = tpu.matmul %7, %8, %cst_8 {dimension_numbers = #tpu.dot_dimension_numbers<[1], [0], [0], [1], [0, 0, 1, 1], [], []>} : vector<2x256xf32>, vector<256x128xf32>, vector<2x128xf32> -> vector<2x128xf32>
    %c0_9 = arith.constant 0 : index
    %c0_10 = arith.constant 0 : index
    %10 = vector.load %arg5[%c0_9, %c0_10] : memref<1x128xf32, #tpu.memory_space<vmem>>, vector<1x128xf32>
    %11 = vector.broadcast %10 : vector<1x128xf32> to vector<2x128xf32>
    %12 = arith.addf %9, %11 : vector<2x128xf32>
    %13 = arith.mulf %12, %12 : vector<2x128xf32>
    %c0_11 = arith.constant 0 : index
    %c0_12 = arith.constant 0 : index
    %14 = vector.load %arg6[%c0_11, %c0_12] : memref<128x128xf32, #tpu.memory_space<vmem>>, vector<128x128xf32>
    %cst_13 = arith.constant dense<0.000000e+00> : vector<2x128xf32>
    %15 = tpu.matmul %13, %14, %cst_13 {dimension_numbers = #tpu.dot_dimension_numbers<[1], [0], [0], [1], [0, 0, 1, 1], [], []>} : vector<2x128xf32>, vector<128x128xf32>, vector<2x128xf32> -> vector<2x128xf32>
    %cst_14 = arith.constant 1.000000e-24 : f32
    %16 = vector.broadcast %cst_14 : f32 to vector<2x128xf32>
    %17 = arith.maximumf %15, %16 : vector<2x128xf32>
    %18 = math.rsqrt %17 : vector<2x128xf32>
    %19 = arith.mulf %12, %18 : vector<2x128xf32>
    %c0_15 = arith.constant 0 : index
    %c0_16 = arith.constant 0 : index
    %20 = vector.load %arg7[%c0_15, %c0_16] : memref<2x128xf32, #tpu.memory_space<vmem>>, vector<2x128xf32>
    tpu.vector_store %arg7[%c0_15, %c0_16], %19 {strides = array<i32>} : memref<2x128xf32, #tpu.memory_space<vmem>>, vector<2x128xf32>,
    return
  }
  func.func @transform_0(%arg0: i32) -> (i32, i32) {
    %c0_i32 = arith.constant 0 : i32
    %c0_i32_0 = arith.constant 0 : i32
    return %arg0, %c0_i32 : i32, i32
  }
  func.func @transform_1(%arg0: i32) -> (i32, i32) {
    %c0_i32 = arith.constant 0 : i32
    %c0_i32_0 = arith.constant 0 : i32
    %c0_i32_1 = arith.constant 0 : i32
    return %c0_i32, %c0_i32_0 : i32, i32
  }
  func.func @transform_2(%arg0: i32) -> (i32, i32) {
    %c0_i32 = arith.constant 0 : i32
    %c0_i32_0 = arith.constant 0 : i32
    %c0_i32_1 = arith.constant 0 : i32
    return %c0_i32, %c0_i32_0 : i32, i32
  }
  func.func @transform_3(%arg0: i32) -> (i32, i32) {
    %c0_i32 = arith.constant 0 : i32
    %c0_i32_0 = arith.constant 0 : i32
    %c0_i32_1 = arith.constant 0 : i32
    return %c0_i32, %c0_i32_0 : i32, i32
  }
  func.func @transform_4(%arg0: i32) -> (i32, i32) {
    %c0_i32 = arith.constant 0 : i32
    %c0_i32_0 = arith.constant 0 : i32
    %c0_i32_1 = arith.constant 0 : i32
    return %c0_i32, %c0_i32_0 : i32, i32
  }
  func.func @transform_5(%arg0: i32) -> (i32, i32) {
    %c0_i32 = arith.constant 0 : i32
    %c0_i32_0 = arith.constant 0 : i32
    %c0_i32_1 = arith.constant 0 : i32
    return %c0_i32, %c0_i32_0 : i32, i32
  }
  func.func @transform_6(%arg0: i32) -> (i32, i32) {
    %c0_i32 = arith.constant 0 : i32
    %c0_i32_0 = arith.constant 0 : i32
    return %arg0, %c0_i32 : i32, i32
  }
}

</mosaic_0001>

<bundles_post_ra>
// kernel: listing_embedding_forward.1
= control target key start
LH: loop header
LB: loop body
LE: loop exit
PB: predicated region body
PF: predicated region fallthrough
CT: control target
= control target key end

     0   :  { %v499_v3 = vmov 0.0   ;;  %vm52_vm0 = vcmask 523264   ;;  %vm501_vm1 = vmmov 0   ;;  %s743_s1 = inlined_call_operand.vmem [shape: f32[64,256], index: 1, kind: input, shape index: {}]   ;;  %s744_s3 = inlined_call_operand.vmem [shape: f32[256,128], index: 3, kind: input, shape index: {}]   ;;  %s745_s0 = inlined_call_operand.vmem [shape: f32[2,64], index: 0, kind: input, shape index: {}]   ;;  %s746_s5 = inlined_call_operand.vmem [shape: f32[128,128], index: 5, kind: input, shape index: {}]   ;;  %s747_s2 = inlined_call_operand.vmem [shape: f32[1,256], index: 2, kind: input, shape index: {}]   ;;  %s748_s4 = inlined_call_operand.vmem [shape: f32[1,128], index: 4, kind: input, shape index: {}]   ;;  %s749_s6 = inlined_call_operand.vmem [shape: f32[2,128], index: 6, kind: output, shape index: {}]  }
   0x1   :  { %v25_v0 = vld [vmem:[%s743_s1 + $0x8] sm:$0xff]  ;;  %v27_v1 = vld [vmem:[%s743_s1 + $0x18] sm:$0xff]  ;;  %v24_v2 = vld [vmem:[%s743_s1] sm:$0xff]  ;;  %120 = vmatprep.mubr.f32.mxu0 %v499_v3 }
   0x2   :  { %v422_v4 = vpack.c.bf16 %v27_v1, %v25_v0  ;;  %v26_v5 = vld [vmem:[%s743_s1 + $0x10] sm:$0xff]  ;;  %v29_v6 = vld [vmem:[%s743_s1 + $0x28] sm:$0xff]  ;;  %v31_v7 = vld [vmem:[%s743_s1 + $0x38] sm:$0xff] }
   0x3   :  { %v424_v8 = vpack.c.bf16 %v26_v5, %v24_v2  ;;  %v426_v9 = vpack.c.bf16 %v31_v7, %v29_v6  ;;  %v28_v10 = vld [vmem:[%s743_s1 + $0x20] sm:$0xff]  ;;  %v30_v11 = vld [vmem:[%s743_s1 + $0x30] sm:$0xff]  ;;  %v33_v12 = vld [vmem:[%s743_s1 + $0x48] sm:$0xff] }
   0x4   :  { %423 = vmatprep.subr.bf16.mxu0 %v422_v4  ;;  %v35_v13 = vld [vmem:[%s743_s1 + $0x58] sm:$0xff]  ;;  %v428_v14 = vpack.c.bf16 %v30_v11, %v28_v10  ;;  %v32_v15 = vld [vmem:[%s743_s1 + $0x40] sm:$0xff]  ;;  %v34_v16 = vld [vmem:[%s743_s1 + $0x50] sm:$0xff]  ;;  %v500_v11 = vmov 0.0|0.0  }
   0x5   :  { %425 = vmatpush1.bf16.msra.mxu0 %v424_v8  ;;  %v430_v17 = vpack.c.bf16 %v35_v13, %v33_v12  ;;  %v37_v18 = vld [vmem:[%s743_s1 + $0x68] sm:$0xff]  ;;  %v39_v19 = vld [vmem:[%s743_s1 + $0x78] sm:$0xff]  ;;  %v145_v20 = vld [vmem:[%s744_s3 + $0x80] sm:$0xff]  ;;  %v432_v29 = vpack.c.bf16 %v34_v16, %v32_v15 }
   0x6   :  { %427 = vmatprep.subr.bf16.mxu0 %v426_v9  ;;  %v146_v21 = vld [vmem:[%s744_s3 + $0x88] sm:$0xff]  ;;  %v129_v22 = vld [vmem:[%s744_s3] sm:$0xff]  ;;  %v147_v26 = vld [vmem:[%s744_s3 + $0x90] sm:$0xff]  ;;  %v434_v34 = vpack.c.bf16 %v39_v19, %v37_v18 }
   0x7   :  { %v130_v23 = vld [vmem:[%s744_s3 + $0x8] sm:$0xff]  ;;  %v438_v24 = vpack.c.bf16 %v146_v21, %v145_v20  ;;  %v148_v27 = vld [vmem:[%s744_s3 + $0x98] sm:$0xff]  ;;  %v131_v28 = vld [vmem:[%s744_s3 + $0x10] sm:$0xff] }
   0x8   :  { %v440_v25 = vpack.c.bf16 %v130_v23, %v129_v22  ;;  %v442_v30 = vpack.c.bf16 %v148_v27, %v147_v26  ;;  %v132_v31 = vld [vmem:[%s744_s3 + $0x18] sm:$0xff]  ;;  %v149_v32 = vld [vmem:[%s744_s3 + $0xa0] sm:$0xff]  ;;  %v150_v33 = vld [vmem:[%s744_s3 + $0xa8] sm:$0xff] }
   0x9   :  { %429 = vmatpush1.bf16.msra.mxu0 %v428_v14  ;;  %v36_v35 = vld [vmem:[%s743_s1 + $0x60] sm:$0xff]  ;;  %v38_v36 = vld [vmem:[%s743_s1 + $0x70] sm:$0xff]  ;;  %439 = vmatprep.subr.bf16.mxu1 %v438_v24  ;;  %v444_v37 = vpack.c.bf16 %v132_v31, %v131_v28  ;;  %v446_v38 = vpack.c.bf16 %v150_v33, %v149_v32  ;;  %v134_v40 = vld [vmem:[%s744_s3 + $0x28] sm:$0xff] }
   0xa   :  { %431 = vmatprep.subr.bf16.mxu0 %v430_v17  ;;  %441 = vmatpush3.bf16.msra.mxu1 %v440_v25  ;;  %v133_v39 = vld [vmem:[%s744_s3 + $0x20] sm:$0xff]  ;;  %v436_v41 = vpack.c.bf16 %v38_v36, %v36_v35  ;;  %v151_v42 = vld [vmem:[%s744_s3 + $0xb0] sm:$0xff]  ;;  %v152_v43 = vld [vmem:[%s744_s3 + $0xb8] sm:$0xff] }
   0xb   :  { %443 = vmatprep.subr.bf16.mxu1 %v442_v30  ;;  %v448_v44 = vpack.c.bf16 %v134_v40, %v133_v39  ;;  %v450_v45 = vpack.c.bf16 %v152_v43, %v151_v42  ;;  %v135_v46 = vld [vmem:[%s744_s3 + $0x30] sm:$0xff]  ;;  %v136_v47 = vld [vmem:[%s744_s3 + $0x38] sm:$0xff]  ;;  %v23_v48 = vld [vmem:[%s745_s0] sm:$0x3]  ;;  %v42_v30 = vlaneseq }
   0xc   :  { %v153_v49 = vld [vmem:[%s744_s3 + $0xc0] sm:$0xff]  ;;  %v154_v50 = vld [vmem:[%s744_s3 + $0xc8] sm:$0xff]  ;;  %v452_v51 = vpack.c.bf16 %v136_v47, %v135_v46  ;;  %v155_v55 = vld [vmem:[%s744_s3 + $0xd0] sm:$0xff] }
   0xd   :  { %433 = vmatpush1.bf16.msra.mxu0 %v432_v29  ;;  %v454_v52 = vpack.c.bf16 %v154_v50, %v153_v49  ;;  %v137_v53 = vld [vmem:[%s744_s3 + $0x40] sm:$0xff]  ;;  %v138_v54 = vld [vmem:[%s744_s3 + $0x48] sm:$0xff]  ;;  %v156_v56 = vld [vmem:[%s744_s3 + $0xd8] sm:$0xff]  ;;  %v43_v31 = vshrl.u32 %v42_v30, 7 }
   0xe   :  { %435 = vmatprep.subr.bf16.mxu0 %v434_v34  ;;  %445 = vmatpush3.bf16.msra.mxu1 %v444_v37  ;;  %v456_v57 = vpack.c.bf16 %v138_v54, %v137_v53  ;;  %v458_v58 = vpack.c.bf16 %v156_v56, %v155_v55  ;;  %v139_v59 = vld [vmem:[%s744_s3 + $0x50] sm:$0xff]  ;;  %v140_v60 = vld [vmem:[%s744_s3 + $0x58] sm:$0xff]  ;;  %v157_v61 = vld [vmem:[%s744_s3 + $0xe0] sm:$0xff] }
   0xf   :  { %447 = vmatprep.subr.bf16.mxu1 %v446_v38  ;;  %v158_v62 = vld [vmem:[%s744_s3 + $0xe8] sm:$0xff]  ;;  %v460_v63 = vpack.c.bf16 %v140_v60, %v139_v59  ;;  %v141_v1 = vld [vmem:[%s744_s3 + $0x60] sm:$0xff]  ;;  %v159_v5 = vld [vmem:[%s744_s3 + $0xf0] sm:$0xff]  ;;  %v44_v32 = vsub.s32 0, %v43_v31  ;;  %v48_v34 = vsub.s32 1, %v43_v31 }
  0x10   :  { %v462_v0 = vpack.c.bf16 %v158_v62, %v157_v61  ;;  %v142_v2 = vld [vmem:[%s744_s3 + $0x68] sm:$0xff]  ;;  %v160_v6 = vld [vmem:[%s744_s3 + $0xf8] sm:$0xff]  ;;  %v143_v8 = vld [vmem:[%s744_s3 + $0x70] sm:$0xff] }
  0x11   :  { %437 = vmatpush1.bf16.msra.mxu0 %v436_v41  ;;  %v464_v4 = vpack.c.bf16 %v142_v2, %v141_v1  ;;  %v466_v7 = vpack.c.bf16 %v160_v6, %v159_v5  ;;  %v144_v9 = vld [vmem:[%s744_s3 + $0x78] sm:$0xff]  ;;  %v239_v12 = vld [vmem:[%s746_s5] sm:$0xff]  ;;  %v240_v13 = vld [vmem:[%s746_s5 + $0x8] sm:$0xff] }
  0x12   :  { %449 = vmatpush3.bf16.msra.mxu1 %v448_v44  ;;  %v468_v10 = vpack.c.bf16 %v144_v9, %v143_v8  ;;  %470 = vmatprep.subr.bf16.mxu0 %v500_v11  ;;  %v241_v14 = vld [vmem:[%s746_s5 + $0x10] sm:$0xff]  ;;  %v471_v15 = vpack.c.bf16 %v240_v13, %v239_v12  ;;  %v242_v16 = vld [vmem:[%s746_s5 + $0x18] sm:$0xff]  ;;  %v243_v18 = vld [vmem:[%s746_s5 + $0x20] sm:$0xff] }
  0x13   :  { %451 = vmatprep.subr.bf16.mxu1 %v450_v45  ;;  %v474_v17 = vpack.c.bf16 %v242_v16, %v241_v14  ;;  %v244_v19 = vld [vmem:[%s746_s5 + $0x28] sm:$0xff]  ;;  %v245_v21 = vld [vmem:[%s746_s5 + $0x30] sm:$0xff]  ;;  %v246_v22 = vld [vmem:[%s746_s5 + $0x38] sm:$0xff] }
  0x14   :  { %333 = vmatmul.mubr.msk.f32.vlgmr.msra.gmra.mrb[0].mxu0 %vm52_vm0, %v23_v48  ;;  %v477_v20 = vpack.c.bf16 %v244_v19, %v243_v18  ;;  %v480_v23 = vpack.c.bf16 %v246_v22, %v245_v21  ;;  %v247_v24 = vld [vmem:[%s746_s5 + $0x40] sm:$0xff]  ;;  %v248_v25 = vld [vmem:[%s746_s5 + $0x48] sm:$0xff]  ;;  %v249_v27 = vld [vmem:[%s746_s5 + $0x50] sm:$0xff] }
  0x15   :  { %472 = vmatpush3.bf16.msra.mxu0 %v471_v15  ;;  %v483_v26 = vpack.c.bf16 %v248_v25, %v247_v24  ;;  %v250_v28 = vld [vmem:[%s746_s5 + $0x58] sm:$0xff]  ;;  %v40_v33 = vld [vmem:[%s747_s2] sm:$0x3]  ;;  %v252_v44 = vld [vmem:[%s746_s5 + $0x68] sm:$0xff]  ;;  %419 = vmatprep.mubr.msk.f32.mxu0 %vm501_vm1, %v499_v3 }
  0x16   :  { %453 = vmatpush3.bf16.msra.mxu1 %v452_v51  ;;  %473 = vmatprep.subr.bf16.mxu0 %v500_v11  ;;  %v486_v29 = vpack.c.bf16 %v250_v28, %v249_v27  ;;  %v45_v35 = vrot.slane %v40_v33, %v44_v32  ;;  %v49_v36 = vrot.slane %v40_v33, %v48_v34  ;;  %v251_v43 = vld [vmem:[%s746_s5 + $0x60] sm:$0xff]  ;;  %v253_v46 = vld [vmem:[%s746_s5 + $0x70] sm:$0xff]  ;;  %v254_v47 = vld [vmem:[%s746_s5 + $0x78] sm:$0xff] }
  0x17   :  { %455 = vmatprep.subr.bf16.mxu1 %v454_v52  ;;  %v489_v45 = vpack.c.bf16 %v252_v44, %v251_v43  ;;  %v492_v48 = vpack.c.bf16 %v254_v47, %v253_v46  ;;  %v334_v50 = vld [vmem:[%s748_s4] ss:$0 sm:$0xff] }
  0x19   :  { %475 = vmatpush3.bf16.msra.mxu0 %v474_v17 }
  0x1a   :  { %457 = vmatpush3.bf16.msra.mxu1 %v456_v57  ;;  %476 = vmatprep.subr.bf16.mxu0 %v500_v11 }
  0x1b   :  { %459 = vmatprep.subr.bf16.mxu1 %v458_v58 }
  0x1d   :  { %478 = vmatpush3.bf16.msra.mxu0 %v477_v20 }
  0x1e   :  { %461 = vmatpush3.bf16.msra.mxu1 %v460_v63  ;;  %479 = vmatprep.subr.bf16.mxu0 %v500_v11 }
  0x1f   :  { %463 = vmatprep.subr.bf16.mxu1 %v462_v0 }
  0x21   :  { %481 = vmatpush3.bf16.msra.mxu0 %v480_v23 }
  0x22   :  { %465 = vmatpush3.bf16.msra.mxu1 %v464_v4  ;;  %482 = vmatprep.subr.bf16.mxu0 %v500_v11 }
  0x23   :  { %467 = vmatprep.subr.bf16.mxu1 %v466_v7 }
  0x25   :  { %484 = vmatpush3.bf16.msra.mxu0 %v483_v26 }
  0x26   :  { %469 = vmatpush3.bf16.msra.mxu1 %v468_v10  ;;  %485 = vmatprep.subr.bf16.mxu0 %v500_v11 }
  0x29   :  { %487 = vmatpush3.bf16.msra.mxu0 %v486_v29 }
  0x2a   :  { %488 = vmatprep.subr.bf16.mxu0 %v500_v11 }
  0x2d   :  { %490 = vmatpush3.bf16.msra.mxu0 %v489_v45 }
  0x2e   :  { %491 = vmatprep.subr.bf16.mxu0 %v500_v11 }
  0x31   :  { %493 = vmatpush3.bf16.msra.mxu0 %v492_v48 }
  0xe7   :  { %v122_v37 = vpop.f32.mrb[0].mxu0 }
  0xe8   :  { %v123_v38 = vadd.f32 %v122_v37, %v45_v35  ;;  %v124_v39 = vpop.f32.mrb[1].mxu0 }
  0xe9   :  { %v125_v40 = vadd.f32 %v124_v39, %v49_v36 }
  0xea   :  { %v127_v42 = vmax.f32 %v123_v38, 0.0 }
  0xeb   :  { %v128_v41 = vmax.f32 %v125_v40, 0.0 }
  0xed   :  { %232 = vmatprep.mubr.f32.mxu1 %v128_v41 }
  0xee   :  { %233 = vmatmul.mubr.f32.vlgmr.msra.gmra.mrb[0].mxu1 %v127_v42 }
 0x1c1   :  { %v367_v49 = vpop.f32.mrb[0].mxu1 }
 0x1c2   :  { %v368_v51 = vpop.f32.mrb[1].mxu1 }
 0x1c3   :  { %v369_v52 = vadd.f32 %v368_v51, %v367_v49 }
 0x1c5   :  { %v235_v53 = vadd.f32 %v369_v52, %v334_v50 }
 0x1c7   :  { %v238_v54 = vmul.f32 %v235_v53, %v235_v53 }
 0x1c9   :  { %420 = vmatmul.mubr.f32.vlgmr.msra.gmra.mrb[2].mxu0 %v238_v54 }
 0x29c   :  { %v321_v55 = vpop.f32.mrb[2].mxu0 }
 0x29d   :  { %v325_v56 = vmax.f32 %v321_v55, 1e-24  ;;  %v421_v57 = vpop.f32.mrb[3].mxu0 }
 0x29f   :  { %497 = vrsqrt.f32 %v325_v56 }
 0x2a9   :  { %v498_v58 = vpop.eup %497 }
 0x2aa   :  { %v327_v59 = vmul.f32 %v498_v58, %v235_v53 }
 0x2ac   :  { %328 = vst [vmem:[%s749_s6] sm:$0x3] %v327_v59 }

</bundles_post_ra>
